<compile_context>
chip_gen: v6e
topology: v6e:2x2x1
jax: 0.10.0
libtpu: 0.0.40
codegen_flags: <defaults>
</compile_context>

<pallas_src>
import functools

import jax
import jax.numpy as jnp
from jax import lax
from jax.experimental import pallas as pl
from jax.experimental.pallas import tpu as pltpu


def _osl_kernel(logits_ref, target_ref,
                loss_ref, nll_ref, osl_ref, osr_ref,
                m_ref, s_ref, tgtlp_ref, eoslp_ref,
                *, pad_idx, eos_idx, margin, weight, strlm, v_tile):
    vi = pl.program_id(1)
    nv = pl.num_programs(1)

    x = logits_ref[...].astype(jnp.float32)          # (TB, T, TV) f32 working tile
    tgt = target_ref[...]                            # (TB, T) int32
    TB, T, TV = x.shape
    v_off = vi * v_tile

    # --- init per-row accumulators on the first vocab tile ---
    @pl.when(vi == 0)
    def _():
        m_ref[...] = jnp.full_like(m_ref, -jnp.inf)
        s_ref[...] = jnp.zeros_like(s_ref)
        tgtlp_ref[...] = jnp.zeros_like(tgtlp_ref)
        eoslp_ref[...] = jnp.zeros_like(eoslp_ref)

    # --- fused target / eos lane extraction (masked select + lane reduce) ---
    vocab_iota = lax.broadcasted_iota(jnp.int32, (TB, T, TV), 2) + v_off
    tgtlp_ref[...] += jnp.sum(
        jnp.where(vocab_iota == tgt[:, :, None], x, 0.0), axis=-1)
    eoslp_ref[...] += jnp.sum(
        jnp.where(vocab_iota == eos_idx, x, 0.0), axis=-1)

    # --- online logsumexp over the streamed vocab axis (skipped for strlm) ---
    if not strlm:
        m_old = m_ref[...]
        m_new = jnp.maximum(m_old, jnp.max(x, axis=-1))
        s_ref[...] = (s_ref[...] * jnp.exp(m_old - m_new)
                      + jnp.sum(jnp.exp(x - m_new[:, :, None]), axis=-1))
        m_ref[...] = m_new

    # --- finalize on the last vocab tile ---
    @pl.when(vi == nv - 1)
    def _():
        if strlm:
            tgt_lp = tgtlp_ref[...]
            eos_lp_raw = eoslp_ref[...]
        else:
            lse = m_ref[...] + jnp.log(s_ref[...])
            tgt_lp = tgtlp_ref[...] - lse
            eos_lp_raw = eoslp_ref[...] - lse

        non_pad = (tgt != pad_idx).astype(jnp.float32)
        nll = -tgt_lp * non_pad                                  # CE / NLL, ignore pad
        tlw = tgt_lp * non_pad
        total = jnp.sum(tlw, axis=-1, keepdims=True)             # (TB, 1)

        # cumsum over T as an MXU matmul against an upper-triangular 0/1 matrix
        s_iota = lax.broadcasted_iota(jnp.int32, (T, T), 0)
        t_iota = lax.broadcasted_iota(jnp.int32, (T, T), 1)
        tri = (s_iota <= t_iota).astype(jnp.float32)             # tri[s, t] = (s <= t)
        csum = jnp.dot(tlw, tri,
                       preferred_element_type=jnp.float32,
                       precision=lax.Precision.HIGHEST)          # (TB, T)

        suffix = tlw + total - csum
        eos_lp = eos_lp_raw * non_pad
        osl = jnp.maximum(eos_lp - suffix + margin, 0.0)
        osr = ((eos_lp > suffix).astype(jnp.float32)
               * non_pad
               * (tgt != eos_idx).astype(jnp.float32))
        loss = (1.0 - weight) * nll + weight * osl

        loss_ref[...] = loss
        nll_ref[...] = nll
        osl_ref[...] = osl
        osr_ref[...] = osr


def _pick_tiles(B, T, V, itemsize, *, max_v_tile=1024,
                vmem_budget_bytes=8 * 1024 * 1024):
    """Pick (batch_tile, vocab_tile). vocab tile is lane-dense (multiple of 128)
    when V is streamed; batch tile is B or an 8-multiple divisor of B that keeps
    the double-buffered logits tile within the budget."""
    if V <= max_v_tile:
        tv = V
    else:
        tv = V
        start = max_v_tile - (max_v_tile % 128)
        for cand in range(start, 127, -128):
            if V % cand == 0:
                tv = cand
                break

    def fits(tb):
        return 2 * tb * T * tv * itemsize <= vmem_budget_bytes

    tb = B
    if not fits(B):
        for cand in range(B - (B % 8), 7, -8):
            if B % cand == 0 and fits(cand):
                tb = cand
                break
    return tb, tv


def oversmoothing_loss(logits, target, *, pad_idx, eos_idx,
                       margin=1e-4, weight=0.5, strlm=False,
                       max_v_tile=1024, vmem_limit_bytes=64 * 1024 * 1024):
    """Returns (loss, nll_loss, os_loss, os_rate), each (B, T) float32.

    `logits` may be bf16/f32 logits (strlm=False) or log-probs (strlm=True);
    they are DMA'd in their native dtype and only cast to f32 per VMEM tile.
    """
    B, T, V = logits.shape
    tb, tv = _pick_tiles(B, T, V, jnp.dtype(logits.dtype).itemsize,
                         max_v_tile=max_v_tile)
    grid = (B // tb, V // tv)

    kernel = functools.partial(
        _osl_kernel, pad_idx=int(pad_idx), eos_idx=int(eos_idx),
        margin=float(margin), weight=float(weight), strlm=bool(strlm),
        v_tile=tv)

    bt = jax.ShapeDtypeStruct((B, T), jnp.float32)
    row_spec = pl.BlockSpec((tb, T), lambda b, v: (b, 0))

    return pl.pallas_call(
        kernel,
        out_shape=(bt, bt, bt, bt),
        grid_spec=pltpu.PrefetchScalarGridSpec(
            num_scalar_prefetch=0,
            grid=grid,
            in_specs=[
                pl.BlockSpec((tb, T, tv), lambda b, v: (b, 0, v)),   # logits tile
                row_spec,                                            # target
            ],
            out_specs=(row_spec, row_spec, row_spec, row_spec),
            scratch_shapes=[pltpu.VMEM((tb, T), jnp.float32)] * 4,   # m, s, tgt, eos
        ),
        compiler_params=pltpu.CompilerParams(
            dimension_semantics=("parallel", "arbitrary"),
            vmem_limit_bytes=vmem_limit_bytes,
        ),
    )(logits, target.astype(jnp.int32))


def _reference(logits, target, *, pad_idx, eos_idx, margin, weight, strlm=False):
    x = logits.astype(jnp.float32)
    lp = x if strlm else jax.nn.log_softmax(x, axis=-1)
    tgt_lp = jnp.take_along_axis(lp, target[..., None].astype(jnp.int32),
                                 axis=-1)[..., 0]
    mask = (target != pad_idx).astype(jnp.float32)
    nll = -tgt_lp * mask
    tlw = tgt_lp * mask
    suffix = tlw + jnp.sum(tlw, -1, keepdims=True) - jnp.cumsum(tlw, -1)
    eos_lp = lp[:, :, eos_idx] * mask
    osl = jnp.maximum(eos_lp - suffix + margin, 0.0)
    osr = ((eos_lp > suffix).astype(jnp.float32) * mask
           * (target != eos_idx).astype(jnp.float32))
    loss = (1.0 - weight) * nll + weight * osl
    return loss, nll, osl, osr


if __name__ == "__main__":
    B, T, V = 2, 8, 256
    pad_idx, eos_idx = 0, 2
    margin, weight = 1e-4, 0.5

    key = jax.random.PRNGKey(0)
    k_logits, k_target = jax.random.split(key)
    logits = jax.random.normal(k_logits, (B, T, V), dtype=jnp.float32)
    target = jax.random.randint(k_target, (B, T), 1, V, dtype=jnp.int32)
    # sequence 0 ends with eos; sequence 1 ends with eos followed by padding
    target = target.at[0, T - 1].set(eos_idx)
    target = target.at[1, T - 3].set(eos_idx)
    target = target.at[1, T - 2:].set(pad_idx)

    # --- logits path (CrossEntropy + in-kernel log_softmax); V streamed in 2 tiles ---
    outs = oversmoothing_loss(logits, target, pad_idx=pad_idx, eos_idx=eos_idx,
                              margin=margin, weight=weight, strlm=False,
                              max_v_tile=128)
    outs = jax.block_until_ready(outs)
    refs = _reference(logits, target, pad_idx=pad_idx, eos_idx=eos_idx,
                      margin=margin, weight=weight, strlm=False)
    for o, r in zip(outs, refs):
        assert o.shape == (B, T) and o.dtype == jnp.float32
        assert jnp.allclose(o, r, atol=1e-5, rtol=1e-5), (o, r)

    # --- strlm path: inputs already log-probs (NLLLoss, no in-kernel softmax) ---
    lprobs = jax.nn.log_softmax(logits, axis=-1)
    outs_s = oversmoothing_loss(lprobs, target, pad_idx=pad_idx, eos_idx=eos_idx,
                                margin=margin, weight=weight, strlm=True,
                                max_v_tile=128)
    outs_s = jax.block_until_ready(outs_s)
    refs_s = _reference(lprobs, target, pad_idx=pad_idx, eos_idx=eos_idx,
                        margin=margin, weight=weight, strlm=True)
    for o, r in zip(outs_s, refs_s):
        assert jnp.allclose(o, r, atol=1e-5, rtol=1e-5), (o, r)

    # --- native-dtype (bf16) logits: DMA'd without any wrapper-side f32 cast ---
    logits_bf16 = logits.astype(jnp.bfloat16)
    outs_b = oversmoothing_loss(logits_bf16, target, pad_idx=pad_idx,
                                eos_idx=eos_idx, margin=margin, weight=weight,
                                strlm=False, max_v_tile=128)
    outs_b = jax.block_until_ready(outs_b)
    refs_b = _reference(logits_bf16, target, pad_idx=pad_idx, eos_idx=eos_idx,
                        margin=margin, weight=weight, strlm=False)
    for o, r in zip(outs_b[:3], refs_b[:3]):
        assert jnp.allclose(o, r, atol=1e-4, rtol=1e-4), (o, r)

    print("KERNEL_OK")
</pallas_src>

<mosaic_0001>
module attributes {stable_mosaic.version = 11 : i64} {
  func.func @_osl_kernel(%arg0: i32, %arg1: i32, %arg2: memref<2x8x128xf32, #tpu.memory_space<vmem>>, %arg3: memref<2x8xi32, #tpu.memory_space<vmem>>, %arg4: memref<2x8xf32, #tpu.memory_space<vmem>>, %arg5: memref<2x8xf32, #tpu.memory_space<vmem>>, %arg6: memref<2x8xf32, #tpu.memory_space<vmem>>, %arg7: memref<2x8xf32, #tpu.memory_space<vmem>>, %arg8: memref<2x8xf32, #tpu.memory_space<vmem>>, %arg9: memref<2x8xf32, #tpu.memory_space<vmem>>, %arg10: memref<2x8xf32, #tpu.memory_space<vmem>>, %arg11: memref<2x8xf32, #tpu.memory_space<vmem>>) attributes {dimension_semantics = [#tpu.dimension_semantics<parallel>, #tpu.dimension_semantics<arbitrary>], iteration_bounds = array<i64: 1, 2>, scalar_prefetch = 0 : i64, scratch_operands = 4 : i64, tpu.core_type = #tpu.core_type<tc>, window_params = [{transform_indices = @transform_0, window_bounds = array<i64: 2, 8, 128>}, {transform_indices = @transform_1, window_bounds = array<i64: 2, 8>}, {transform_indices = @transform_2, window_bounds = array<i64: 2, 8>}, {transform_indices = @transform_3, window_bounds = array<i64: 2, 8>}, {transform_indices = @transform_4, window_bounds = array<i64: 2, 8>}, {transform_indices = @transform_5, window_bounds = array<i64: 2, 8>}]} {
    %c0 = arith.constant 0 : index
    %c0_0 = arith.constant 0 : index
    %c0_1 = arith.constant 0 : index
    %0 = vector.load %arg2[%c0, %c0_0, %c0_1] : memref<2x8x128xf32, #tpu.memory_space<vmem>>, vector<2x8x128xf32>
    %c0_2 = arith.constant 0 : index
    %c0_3 = arith.constant 0 : index
    %1 = vector.load %arg3[%c0_2, %c0_3] : memref<2x8xi32, #tpu.memory_space<vmem>>, vector<2x8xi32>
    %c128_i32 = arith.constant 128 : i32
    %2 = arith.muli %arg1, %c128_i32 : i32
    %c0_i32 = arith.constant 0 : i32
    %3 = arith.cmpi eq, %arg1, %c0_i32 : i32
    %4 = arith.extui %3 : i1 to i32
    %c0_i32_4 = arith.constant 0 : i32
    %5 = arith.cmpi ne, %4, %c0_i32_4 : i32
    scf.if %5 {
      %cst_27 = arith.constant 0xFF800000 : f32
      %44 = vector.broadcast %cst_27 : f32 to vector<2x8xf32>
      %c0_28 = arith.constant 0 : index
      %c0_29 = arith.constant 0 : index
      %45 = vector.load %arg8[%c0_28, %c0_29] : memref<2x8xf32, #tpu.memory_space<vmem>>, vector<2x8xf32>
      tpu.vector_store %arg8[%c0_28, %c0_29], %44 {strides = array<i32>} : memref<2x8xf32, #tpu.memory_space<vmem>>, vector<2x8xf32>,
      %cst_30 = arith.constant 0.000000e+00 : f32
      %46 = vector.broadcast %cst_30 : f32 to vector<2x8xf32>
      %c0_31 = arith.constant 0 : index
      %c0_32 = arith.constant 0 : index
      %47 = vector.load %arg9[%c0_31, %c0_32] : memref<2x8xf32, #tpu.memory_space<vmem>>, vector<2x8xf32>
      tpu.vector_store %arg9[%c0_31, %c0_32], %46 {strides = array<i32>} : memref<2x8xf32, #tpu.memory_space<vmem>>, vector<2x8xf32>,
      %cst_33 = arith.constant 0.000000e+00 : f32
      %48 = vector.broadcast %cst_33 : f32 to vector<2x8xf32>
      %c0_34 = arith.constant 0 : index
      %c0_35 = arith.constant 0 : index
      %49 = vector.load %arg10[%c0_34, %c0_35] : memref<2x8xf32, #tpu.memory_space<vmem>>, vector<2x8xf32>
      tpu.vector_store %arg10[%c0_34, %c0_35], %48 {strides = array<i32>} : memref<2x8xf32, #tpu.memory_space<vmem>>, vector<2x8xf32>,
      %cst_36 = arith.constant 0.000000e+00 : f32
      %50 = vector.broadcast %cst_36 : f32 to vector<2x8xf32>
      %c0_37 = arith.constant 0 : index
      %c0_38 = arith.constant 0 : index
      %51 = vector.load %arg11[%c0_37, %c0_38] : memref<2x8xf32, #tpu.memory_space<vmem>>, vector<2x8xf32>
      tpu.vector_store %arg11[%c0_37, %c0_38], %50 {strides = array<i32>} : memref<2x8xf32, #tpu.memory_space<vmem>>, vector<2x8xf32>,
    } else {
    }
    %6 = tpu.iota {dimensions = array<i32: 2>} : vector<2x8x128xi32>
    %7 = vector.broadcast %2 : i32 to vector<2x8x128xi32>
    %8 = arith.addi %6, %7 : vector<2x8x128xi32>
    %c0_5 = arith.constant 0 : index
    %c0_6 = arith.constant 0 : index
    %9 = vector.load %arg10[%c0_5, %c0_6] : memref<2x8xf32, #tpu.memory_space<vmem>>, vector<2x8xf32>
    %10 = vector.shape_cast %1 : vector<2x8xi32> to vector<2x8x1xi32>
    %11 = vector.broadcast %10 : vector<2x8x1xi32> to vector<2x8x128xi32>
    %12 = arith.cmpi eq, %8, %11 : vector<2x8x128xi32>
    %cst = arith.constant 0.000000e+00 : f32
    %13 = vector.broadcast %cst : f32 to vector<2x8x128xf32>
    %14 = arith.select %12, %0, %13 : vector<2x8x128xi1>, vector<2x8x128xf32>
    %cst_7 = arith.constant dense<0.000000e+00> : vector<2x8xf32>
    %15 = vector.multi_reduction <add>, %14, %cst_7 [2] : vector<2x8x128xf32> to vector<2x8xf32>
    %16 = arith.addf %9, %15 : vector<2x8xf32>
    %c0_8 = arith.constant 0 : index
    %c0_9 = arith.constant 0 : index
    %17 = vector.load %arg10[%c0_8, %c0_9] : memref<2x8xf32, #tpu.memory_space<vmem>>, vector<2x8xf32>
    tpu.vector_store %arg10[%c0_8, %c0_9], %16 {strides = array<i32>} : memref<2x8xf32, #tpu.memory_space<vmem>>, vector<2x8xf32>,
    %c0_10 = arith.constant 0 : index
    %c0_11 = arith.constant 0 : index
    %18 = vector.load %arg11[%c0_10, %c0_11] : memref<2x8xf32, #tpu.memory_space<vmem>>, vector<2x8xf32>
    %c2_i32 = arith.constant 2 : i32
    %19 = vector.broadcast %c2_i32 : i32 to vector<2x8x128xi32>
    %20 = arith.cmpi eq, %8, %19 : vector<2x8x128xi32>
    %cst_12 = arith.constant 0.000000e+00 : f32
    %21 = vector.broadcast %cst_12 : f32 to vector<2x8x128xf32>
    %22 = arith.select %20, %0, %21 : vector<2x8x128xi1>, vector<2x8x128xf32>
    %cst_13 = arith.constant dense<0.000000e+00> : vector<2x8xf32>
    %23 = vector.multi_reduction <add>, %22, %cst_13 [2] : vector<2x8x128xf32> to vector<2x8xf32>
    %24 = arith.addf %18, %23 : vector<2x8xf32>
    %c0_14 = arith.constant 0 : index
    %c0_15 = arith.constant 0 : index
    %25 = vector.load %arg11[%c0_14, %c0_15] : memref<2x8xf32, #tpu.memory_space<vmem>>, vector<2x8xf32>
    tpu.vector_store %arg11[%c0_14, %c0_15], %24 {strides = array<i32>} : memref<2x8xf32, #tpu.memory_space<vmem>>, vector<2x8xf32>,
    %c0_16 = arith.constant 0 : index
    %c0_17 = arith.constant 0 : index
    %26 = vector.load %arg8[%c0_16, %c0_17] : memref<2x8xf32, #tpu.memory_space<vmem>>, vector<2x8xf32>
    %cst_18 = arith.constant dense<0xFF800000> : vector<2x8xf32>
    %27 = vector.multi_reduction <maximumf>, %0, %cst_18 [2] : vector<2x8x128xf32> to vector<2x8xf32>
    %28 = arith.maximumf %26, %27 : vector<2x8xf32>
    %c0_19 = arith.constant 0 : index
    %c0_20 = arith.constant 0 : index
    %29 = vector.load %arg9[%c0_19, %c0_20] : memref<2x8xf32, #tpu.memory_space<vmem>>, vector<2x8xf32>
    %30 = arith.subf %26, %28 : vector<2x8xf32>
    %31 = math.exp %30 : vector<2x8xf32>
    %32 = arith.mulf %29, %31 : vector<2x8xf32>
    %33 = vector.shape_cast %28 : vector<2x8xf32> to vector<2x8x1xf32>
    %34 = vector.broadcast %33 : vector<2x8x1xf32> to vector<2x8x128xf32>
    %35 = arith.subf %0, %34 : vector<2x8x128xf32>
    %36 = math.exp %35 : vector<2x8x128xf32>
    %cst_21 = arith.constant dense<0.000000e+00> : vector<2x8xf32>
    %37 = vector.multi_reduction <add>, %36, %cst_21 [2] : vector<2x8x128xf32> to vector<2x8xf32>
    %38 = arith.addf %32, %37 : vector<2x8xf32>
    %c0_22 = arith.constant 0 : index
    %c0_23 = arith.constant 0 : index
    %39 = vector.load %arg9[%c0_22, %c0_23] : memref<2x8xf32, #tpu.memory_space<vmem>>, vector<2x8xf32>
    tpu.vector_store %arg9[%c0_22, %c0_23], %38 {strides = array<i32>} : memref<2x8xf32, #tpu.memory_space<vmem>>, vector<2x8xf32>,
    %c0_24 = arith.constant 0 : index
    %c0_25 = arith.constant 0 : index
    %40 = vector.load %arg8[%c0_24, %c0_25] : memref<2x8xf32, #tpu.memory_space<vmem>>, vector<2x8xf32>
    tpu.vector_store %arg8[%c0_24, %c0_25], %28 {strides = array<i32>} : memref<2x8xf32, #tpu.memory_space<vmem>>, vector<2x8xf32>,
    %c1_i32 = arith.constant 1 : i32
    %41 = arith.cmpi eq, %arg1, %c1_i32 : i32
    %42 = arith.extui %41 : i1 to i32
    %c0_i32_26 = arith.constant 0 : i32
    %43 = arith.cmpi ne, %42, %c0_i32_26 : i32
    scf.if %43 {
      %c0_27 = arith.constant 0 : index
      %c0_28 = arith.constant 0 : index
      %44 = vector.load %arg8[%c0_27, %c0_28] : memref<2x8xf32, #tpu.memory_space<vmem>>, vector<2x8xf32>
      %c0_29 = arith.constant 0 : index
      %c0_30 = arith.constant 0 : index
      %45 = vector.load %arg9[%c0_29, %c0_30] : memref<2x8xf32, #tpu.memory_space<vmem>>, vector<2x8xf32>
      %46 = math.log %45 : vector<2x8xf32>
      %47 = arith.addf %44, %46 : vector<2x8xf32>
      %c0_31 = arith.constant 0 : index
      %c0_32 = arith.constant 0 : index
      %48 = vector.load %arg10[%c0_31, %c0_32] : memref<2x8xf32, #tpu.memory_space<vmem>>, vector<2x8xf32>
      %49 = arith.subf %48, %47 : vector<2x8xf32>
      %c0_33 = arith.constant 0 : index
      %c0_34 = arith.constant 0 : index
      %50 = vector.load %arg11[%c0_33, %c0_34] : memref<2x8xf32, #tpu.memory_space<vmem>>, vector<2x8xf32>
      %51 = arith.subf %50, %47 : vector<2x8xf32>
      %c0_i32_35 = arith.constant 0 : i32
      %52 = vector.broadcast %c0_i32_35 : i32 to vector<2x8xi32>
      %53 = arith.cmpi ne, %1, %52 : vector<2x8xi32>
      %54 = arith.extui %53 : vector<2x8xi1> to vector<2x8xi32>
      %55 = arith.sitofp %54 : vector<2x8xi32> to vector<2x8xf32>
      %cst_36 = arith.constant 0.000000e+00 : f32
      %56 = vector.broadcast %cst_36 : f32 to vector<2x8xf32>
      %57 = arith.subf %56, %49 : vector<2x8xf32>
      %58 = arith.mulf %57, %55 : vector<2x8xf32>
      %59 = arith.mulf %49, %55 : vector<2x8xf32>
      %cst_37 = arith.constant dense<0.000000e+00> : vector<2xf32>
      %60 = vector.multi_reduction <add>, %59, %cst_37 [1] : vector<2x8xf32> to vector<2xf32>
      %61 = vector.shape_cast %60 : vector<2xf32> to vector<2x1xf32>
      %62 = tpu.iota {dimensions = array<i32: 0>} : vector<8x8xi32>
      %63 = tpu.iota {dimensions = array<i32: 1>} : vector<8x8xi32>
      %64 = arith.cmpi sle, %62, %63 : vector<8x8xi32>
      %65 = arith.extui %64 : vector<8x8xi1> to vector<8x8xi32>
      %66 = arith.sitofp %65 : vector<8x8xi32> to vector<8x8xf32>
      %cst_38 = arith.constant dense<0.000000e+00> : vector<2x8xf32>
      %67 = tpu.matmul %59, %66, %cst_38 {dimension_numbers = #tpu.dot_dimension_numbers<[1], [0], [0], [1], [0, 0, 1, 1], [], []>, precision = #tpu.contract_precision<fp32>} : vector<2x8xf32>, vector<8x8xf32>, vector<2x8xf32> -> vector<2x8xf32>
      %68 = vector.broadcast %61 : vector<2x1xf32> to vector<2x8xf32>
      %69 = arith.addf %59, %68 : vector<2x8xf32>
      %70 = arith.subf %69, %67 : vector<2x8xf32>
      %71 = arith.mulf %51, %55 : vector<2x8xf32>
      %72 = arith.subf %71, %70 : vector<2x8xf32>
      %cst_39 = arith.constant 9.99999974E-5 : f32
      %73 = vector.broadcast %cst_39 : f32 to vector<2x8xf32>
      %74 = arith.addf %72, %73 : vector<2x8xf32>
      %cst_40 = arith.constant 0.000000e+00 : f32
      %75 = vector.broadcast %cst_40 : f32 to vector<2x8xf32>
      %76 = arith.maximumf %74, %75 : vector<2x8xf32>
      %77 = arith.cmpf ogt, %71, %70 : vector<2x8xf32>
      %78 = arith.extui %77 : vector<2x8xi1> to vector<2x8xi32>
      %79 = arith.sitofp %78 : vector<2x8xi32> to vector<2x8xf32>
      %80 = arith.mulf %79, %55 : vector<2x8xf32>
      %c2_i32_41 = arith.constant 2 : i32
      %81 = vector.broadcast %c2_i32_41 : i32 to vector<2x8xi32>
      %82 = arith.cmpi ne, %1, %81 : vector<2x8xi32>
      %83 = arith.extui %82 : vector<2x8xi1> to vector<2x8xi32>
      %84 = arith.sitofp %83 : vector<2x8xi32> to vector<2x8xf32>
      %85 = arith.mulf %80, %84 : vector<2x8xf32>
      %cst_42 = arith.constant 5.000000e-01 : f32
      %86 = vector.broadcast %cst_42 : f32 to vector<2x8xf32>
      %87 = arith.mulf %86, %58 : vector<2x8xf32>
      %cst_43 = arith.constant 5.000000e-01 : f32
      %88 = vector.broadcast %cst_43 : f32 to vector<2x8xf32>
      %89 = arith.mulf %88, %76 : vector<2x8xf32>
      %90 = arith.addf %87, %89 : vector<2x8xf32>
      %c0_44 = arith.constant 0 : index
      %c0_45 = arith.constant 0 : index
      %91 = vector.load %arg4[%c0_44, %c0_45] : memref<2x8xf32, #tpu.memory_space<vmem>>, vector<2x8xf32>
      tpu.vector_store %arg4[%c0_44, %c0_45], %90 {strides = array<i32>} : memref<2x8xf32, #tpu.memory_space<vmem>>, vector<2x8xf32>,
      %c0_46 = arith.constant 0 : index
      %c0_47 = arith.constant 0 : index
      %92 = vector.load %arg5[%c0_46, %c0_47] : memref<2x8xf32, #tpu.memory_space<vmem>>, vector<2x8xf32>
      tpu.vector_store %arg5[%c0_46, %c0_47], %58 {strides = array<i32>} : memref<2x8xf32, #tpu.memory_space<vmem>>, vector<2x8xf32>,
      %c0_48 = arith.constant 0 : index
      %c0_49 = arith.constant 0 : index
      %93 = vector.load %arg6[%c0_48, %c0_49] : memref<2x8xf32, #tpu.memory_space<vmem>>, vector<2x8xf32>
      tpu.vector_store %arg6[%c0_48, %c0_49], %76 {strides = array<i32>} : memref<2x8xf32, #tpu.memory_space<vmem>>, vector<2x8xf32>,
      %c0_50 = arith.constant 0 : index
      %c0_51 = arith.constant 0 : index
      %94 = vector.load %arg7[%c0_50, %c0_51] : memref<2x8xf32, #tpu.memory_space<vmem>>, vector<2x8xf32>
      tpu.vector_store %arg7[%c0_50, %c0_51], %85 {strides = array<i32>} : memref<2x8xf32, #tpu.memory_space<vmem>>, vector<2x8xf32>,
    } else {
    }
    return
  }
  func.func @transform_0(%arg0: i32, %arg1: i32) -> (i32, i32, i32) {
    %c0_i32 = arith.constant 0 : i32
    %c0_i32_0 = arith.constant 0 : i32
    return %arg0, %c0_i32, %arg1 : i32, i32, i32
  }
  func.func @transform_1(%arg0: i32, %arg1: i32) -> (i32, i32) {
    %c0_i32 = arith.constant 0 : i32
    %c0_i32_0 = arith.constant 0 : i32
    return %arg0, %c0_i32 : i32, i32
  }
  func.func @transform_2(%arg0: i32, %arg1: i32) -> (i32, i32) {
    %c0_i32 = arith.constant 0 : i32
    %c0_i32_0 = arith.constant 0 : i32
    return %arg0, %c0_i32 : i32, i32
  }
  func.func @transform_3(%arg0: i32, %arg1: i32) -> (i32, i32) {
    %c0_i32 = arith.constant 0 : i32
    %c0_i32_0 = arith.constant 0 : i32
    return %arg0, %c0_i32 : i32, i32
  }
  func.func @transform_4(%arg0: i32, %arg1: i32) -> (i32, i32) {
    %c0_i32 = arith.constant 0 : i32
    %c0_i32_0 = arith.constant 0 : i32
    return %arg0, %c0_i32 : i32, i32
  }
  func.func @transform_5(%arg0: i32, %arg1: i32) -> (i32, i32) {
    %c0_i32 = arith.constant 0 : i32
    %c0_i32_0 = arith.constant 0 : i32
    return %arg0, %c0_i32 : i32, i32
  }
}

</mosaic_0001>

<bundles_post_ra>
// kernel: tpu_custom_call.1
= control target key start
LH: loop header
LB: loop body
LE: loop exit
PB: predicated region body
PF: predicated region fallthrough
CT: control target
= control target key end

     0   :  { %11 = vsyncpa [#allocation7], 0  ;;  %s1761_s0 = inlined_call_operand.hbm [shape: f32[2,8,256], index: 0, kind: input, shape index: {}]   ;;  %s1762_s1 = inlined_call_operand.hbm [shape: s32[2,8], index: 1, kind: input, shape index: {}]   ;;  %s1763_s2 = inlined_call_operand.hbm [shape: f32[2,8], index: 2, kind: output, shape index: {0}]   ;;  %s1764_s3 = inlined_call_operand.hbm [shape: f32[2,8], index: 3, kind: output, shape index: {1}]   ;;  %s1765_s4 = inlined_call_operand.hbm [shape: f32[2,8], index: 4, kind: output, shape index: {2}]   ;;  %s1766_s5 = inlined_call_operand.hbm [shape: f32[2,8], index: 5, kind: output, shape index: {3}]  }
   0x1   :  { %13 = vsyncpa [#allocation7 + $0x1], 0 }
   0x2   :  { %14 = vsyncpa [#allocation10], 0 }
   0x3   :  { %15 = vsyncpa [#allocation8], 0 }
   0x4   :  { %16 = vsyncpa [#allocation13], 0 }
   0x5   :  { %17 = vsyncpa [#allocation16], 0  ;;  %s1524_s18 = smov 0   ;;  %s1526_s19 = smov 0  }
   0x6   :  { %s1528_s20 = smov 0   ;;  %s1530_s21 = smov 0  }
   0x7   :  { %s1532_s22 = smov 0   ;;  %s1534_s23 = smov 0  }
   0x8 LB: > { %s1081_s24 = sadd.s32 4294967295, %s1478_s23   ;;  %s44_s25 = sadd.s32 1, %s1466_s20  ;;  %s1478_s23 = sphi %s1534_s23, %s23_s23   ;;  %s1474_s22 = sphi %s1532_s22, %s1780_s22   ;;  %s1470_s21 = sphi %s1530_s21, %s1779_s21   ;;  %s1466_s20 = sphi %s1528_s20, %s1778_s20   ;;  %s1462_s19 = sphi %s1526_s19, %s1777_s19   ;;  %s1458_s18 = sphi %s1524_s18, %s1776_s18  }
   0x9   : > { %p51_p0 = scmp.ne.s32.totalorder %s1466_s20, %s1462_s19  ;;  %p52_p1 = scmp.eq.s32.totalorder %s1478_s23, 0 }
   0xa   : > { %p57_p2 = scmp.ne.s32.totalorder %s1462_s19, %s1458_s18  ;;  %p1560_p3 = scmp.eq.s32.totalorder %s1081_s24, 0 }
   0xb   : > { %p53_p4 = por %p52_p1, %p51_p0  ;;  %p1082_p5 = scmp.ge.s32.totalorder %s1478_s23, 1 }
   0xc   : > { %p1567_p6 = por %p1560_p3, %p57_p2  ;;  %p198_p7 = scmp.lt.s32.totalorder %s1478_s23, 3 }
   0xd   : > { %s1480_s29 = smov [#allocation9]   ;;  %p1183_p10 = scmp.lt.s32.totalorder %s1478_s23, 2 }
   0xe   : > { %s1770_s27 = scalar_select %p1567_p6, 1, 0 }
   0xf   : > { %p1572_p8 = pnand %p1082_p5, %p198_p7  ;;  %s213_s30 = sshll.u32 %s1480_s29, 4  ;;  %s214_s30 = int_to_ptr.vmem [resolvable:$true] %s213_s30 }
  0x10   : > { %s224_s6 = sand.u32 1, %s1466_s20   ;;  %p1582_p12 = pnand %p1183_p10, %p53_p4 }
  0x11   : > { %s1771_s28 = scalar_select %p1572_p8, 1, 0 }
  0x12   : > { %p1174_p9 = pneg %p1572_p8  ;;  %s1273_s8 = scalar_lea.vmem %s214_s30, 32 }
  0x13   : > { %p1274_p0 = scmp.ne.s32.totalorder %s214_s30, %s1273_s8  ;;  %p1281_p5 = scmp.lt.s32.totalorder %s214_s30, %s214_s30 }
  0x14   : > { %p1175_p11 = pnand %p1174_p9, %p1560_p3  ;;  %p1282_p7 = scmp.lt.s32.totalorder %s1273_s8, %s1273_s8 }
  0x16   : > { %p1264_p13 = pneg %p1175_p11  ;;  %p1283_p6 = por %p1282_p7, %p1281_p5 }
  0x18   : > { %p1276_p1 = pnand %p1274_p0, %p1264_p13 }
  0x1a   : > { %p1277_p2 = pneg %p1276_p1 }
  0x1c   : > { %p1284_p8 = pnand %p1283_p6, %p1277_p2 }
  0x1e   : > { %1287 = shalt.err (!%p1284_p8)
}
  0x1f   : > { %1177 = dma.hbm_to_vmem [thread:$0]  (!%p1175_p11), %s1762_s1, 32, %s214_s30, [#allocation10]  }
  0x20   : > { %s32_s11 = sadd.s32 1, %s1474_s22  ;;  %s1085_s12 = sshll.u32 %s224_s6, 4 }
  0x21   : > { %p33_p4 = scmp.ge.s32.totalorder %s32_s11, 2  ;;  %s1086_s13 = sshll.u32 %s1474_s22, 7 }
  0x22   : > { %s228_s14 = scalar_lea.vmem [#allocation6], %s1085_s12  ;;  %s236_s18 = scalar_lea.hbm %s1761_s0, %s1086_s13 }
  0x23   : > { %s237_s15 = sshll.u32 %s228_s14, 4  ;;  %s1782_s11 = smov (%p33_p4, %s32_s11), 0  ;;  %s238_s15 = int_to_ptr.vmem [resolvable:$true] %s237_s15 }
  0x24   : > { %s40_s29 = ssub.s32 %s1474_s22, %s1782_s11  ;;  %s225_s30 = scalar_lea.sflag [#allocation7], %s224_s6 }
  0x25   : > { %p42_p6 = scmp.eq.s32.totalorder %s40_s29, 0  ;;  %p1290_p8 = pneg %p1582_p12 }
  0x26   : > { %s1301_s9 = scalar_lea.vmem %s238_s15, 256  ;;  %s1481_s10 = smov [#allocation6]  }
  0x27   : > { %s1601_s8 = scalar_select %p42_p6, %s1466_s20, %s44_s25  }
  0x28   : > { %p1302_p9 = scmp.ne.s32.totalorder %s238_s15, %s1301_s9  ;;  %s1306_s12 = sshll.u32 %s1481_s10, 4  ;;  %s1307_s12 = int_to_ptr.vmem [resolvable:$false] %s1306_s12 }
  0x29   : > { %s1308_s14 = scalar_lea.vmem %s1307_s12, 512  ;;  %p1309_p13 = scmp.lt.s32.totalorder %s238_s15, %s1307_s12 }
  0x2a   : > { %p1304_p10 = pnand %p1302_p9, %p1290_p8  ;;  %p1310_p0 = scmp.lt.s32.totalorder %s1308_s14, %s1301_s9 }
  0x2c   : > { %p1305_p11 = pneg %p1304_p10  ;;  %p1311_p1 = por %p1310_p0, %p1309_p13 }
  0x2e   : > { %p1312_p2 = pnand %p1311_p1, %p1305_p11 }
  0x30   : > { %1315 = shalt.err (!%p1312_p2)
}
  0x31   : > { %s1482_s13 = smov 256   ;;  %s1483_s25 = smov 128  }
  0x32   : > { %s1484_s16 = smov 8   ;;  %p1773_p5 = scmp.ne.s32.totalorder %s1771_s28, 0 }
  0x33   : > { %1181 = dma.hbm_to_vmem [thread:$0]  (!%p1582_p12), %s236_s18, 256, %s238_s15, %s225_s30, %s1482_s13, %s1483_s25, %s1484_s16  }
  0x34   : > { %249 = sbr.rel (%p1773_p5) target bundleno = 814 (0x32e), region = 28  ;;  %s251_s6 = sand.u32 (!%p1773_p5), 1, %s1462_s19  }
  0x35   : > { %s1088_s17 = sshll.u32 (!%p1773_p5), %s251_s6, 4  ;;  %s252_s29 = scalar_lea.sflag (!%p1773_p5), [#allocation7], %s251_s6 }
  0x36   : > { %s255_s10 = scalar_lea.vmem (!%p1773_p5), [#allocation6], %s1088_s17  ;;  %p1774_p7 = scmp.ne.s32.totalorder (!%p1773_p5), %s1770_s27, 0 }
  0x39   : > { %1437 = dma.done.wait (%p1774_p7), %s252_s29, 256  }
  0x3a   : > { %1439 = vsyncadd (%p1774_p7), %s252_s29, 4294967040 }
  0x3b   : > { %1441 = dma.done.wait (%p1560_p3), [#allocation10], 32  }
  0x3c   : > { %1443 = vsyncadd (%p1560_p3), [#allocation10], 4294967264  ;;  %s1090_s28 = sshll.u32 %s1470_s21, 7  ;;  %v282_v0 = vld [vmem:[%s255_s10] sm:$0xff]  ;;  %v283_v1 = vld [vmem:[%s255_s10 + $0x8] sm:$0xff]  ;;  %p1091_p12 = scmp.ne.s32.totalorder %s1470_s21, 0 }
  0x3d   : > { %v1619_v2 = vld [vmem:[#allocation9] sm:$0x3] }
  0x3e   : > { %289 = sbr.rel (%p1091_p12) target bundleno = 70 (0x46), region = 40 }
  0x43   : > { %vm290_vm0 = vcmask 58368   ;;  %v1485_v3 = vmov -inf   ;;  %v1486_v4 = vmov 0.0  }
  0x44   : > { %291 = vst.msk [vmem:[#allocation2] sm:$0x3] %vm290_vm0, %v1485_v3  ;;  %292 = vst.msk [vmem:[#allocation3] sm:$0x3] %vm290_vm0, %v1486_v4 }
  0x45   : > { %293 = vst.msk [vmem:[#allocation4] sm:$0x3] %vm290_vm0, %v1486_v4  ;;  %294 = vst.msk [vmem:[#allocation5] sm:$0x3] %vm290_vm0, %v1486_v4 }
  0x46 PF: > { %361 = vmax.xlane.f32.xlu0 %v282_v0  ;;  %v295_v5 = vlaneseq  ;;  %vm332_vm1 = vcmask 1041409   ;;  %vm336_vm2 = vcmask 58368   ;;  %v297_v23 = vstv %s1090_s28  ;;  %p1092_p3 = scmp.ne.s32.totalorder %s1470_s21, 1 }
  0x48   : > { %v1622_v6 = vand.u32 127, %v295_v5  ;;  %v1624_v7 = vshrl.u32 %v295_v5, 7 }
  0x4a   : > { %363 = vmax.xlane.f32.xlu0 %v283_v1  ;;  %v1628_v8 = vsub.s32 %v1622_v6, %v1624_v7  ;;  %v302_v9 = vsub.s32 0, %v1624_v7  ;;  %v309_v20 = vsub.s32 1, %v1624_v7  ;;  %v298_v24 = vadd.s32 %v297_v23, %v1622_v6 }
  0x4b   : > { %v360_v14 = vld [vmem:[#allocation2] sm:$0x3]  ;;  %v378_v56 = vld [vmem:[#allocation3] sm:$0x3] }
  0x4c   : > { %v303_v10 = vrot.slane %v1619_v2, %v302_v9  ;;  %v310_v22 = vrot.slane %v1619_v2, %v309_v20  ;;  %vm339_vm4 = vcmp.eq.s32.totalorder %v298_v24, 2  ;;  %v338_v43 = vld [vmem:[#allocation5] sm:$0x3]  ;;  %v299_v50 = vld [vmem:[#allocation4] sm:$0x3] }
  0x4d   : > { %v340_v27 = vsel %vm339_vm4, %v282_v0, 0.0  ;;  %v341_v28 = vsel %vm339_vm4, %v283_v1, 0.0 }
  0x60   : > { %305 = vbcast.lane.b32.xlu0 %v303_v10, 256 }
  0xcf   : > { %v362_v11 = vpop.xlane.xlu0 %361 }
  0xd0   : > { %v370_v13 = vrot.slane %v362_v11, %v1628_v8 }
  0xd3   : > { %v364_v12 = vpop.xlane.xlu0 %363 }
  0xd4   : > { %v374_v15 = vrot.slane %v364_v12, %v1628_v8 }
  0xd6   : > { %v375_v16 = vsel %vm332_vm1, %v374_v15, %v370_v13 }
  0xd7   : > { %v377_v17 = vmax.f32 %v360_v14, %v375_v16  ;;  %v306_v25 = vpop.permute.xlu0 %305 }
  0xd8   : > { %vm314_vm3 = vcmp.eq.s32.totalorder %v298_v24, %v306_v25 }
  0xd9   : > { %v379_v18 = vsub.f32 %v360_v14, %v377_v17  ;;  %421 = vst.msk [vmem:[#allocation2] sm:$0x3] %vm336_vm2, %v377_v17  ;;  %v386_v19 = vrot.slane %v377_v17, %v302_v9  ;;  %v393_v21 = vrot.slane %v377_v17, %v309_v20  ;;  %v316_v26 = vsel %vm314_vm3, %v282_v0, 0.0 }
  0xdb   : > { %388 = vbcast.lane.b32.xlu1 %v386_v19, 256  ;;  %v380_v47 = vmul.f32 1.442695, %v379_v18 }
  0xdf   : > { %395 = vbcast.lane.b32.xlu1 %v393_v21, 256 }
  0xe3   : > { %312 = vbcast.lane.b32.xlu1 %v310_v22, 256 }
 0x107   : > { %318 = vadd.xlane.f32.xlu1 %v316_v26 }
 0x10b   : > { %342 = vadd.xlane.f32.xlu1 %v340_v27 }
 0x10f   : > { %344 = vadd.xlane.f32.xlu1 %v341_v28 }
 0x14d   : > { %v389_v29 = vpop.permute.xlu1 %388 }
 0x14e   : > { %v397_v30 = vsub.f32 %v282_v0, %v389_v29 }
 0x150   : > { %v399_v31 = vmul.f32 1.442695, %v397_v30 }
 0x151   : > { %v396_v32 = vpop.permute.xlu1 %395 }
 0x152   : > { %1254 = vpow2.f32 %v399_v31  ;;  %v398_v33 = vsub.f32 %v283_v1, %v396_v32 }
 0x154   : > { %v401_v34 = vmul.f32 1.442695, %v398_v33 }
 0x155   : > { %v313_v35 = vpop.permute.xlu1 %312 }
 0x156   : > { %1256 = vpow2.f32 %v401_v34  ;;  %vm315_vm5 = vcmp.eq.s32.totalorder %v298_v24, %v313_v35 }
 0x157   : > { %v317_v36 = vsel %vm315_vm5, %v283_v1, 0.0  ;;  %1258 = vpow2.f32 %v380_v47 }
 0x158   : > { %320 = vadd.xlane.f32.xlu0 %v317_v36 }
 0x15f   : > { %v1255_v37 = vpop.eup %1254 }
 0x160   : > { %403 = vadd.xlane.f32.xlu1 %v1255_v37 }
 0x163   : > { %v1257_v38 = vpop.eup %1256 }
 0x164   : > { %405 = vadd.xlane.f32.xlu1 %v1257_v38  ;;  %v1259_v55 = vpop.eup %1258 }
 0x165   : > { %v382_v60 = vmul.f32 %v1259_v55, %v378_v56 }
 0x190   : > { %v319_v39 = vpop.xlane.xlu1 %318 }
 0x191   : > { %v327_v49 = vrot.slane %v319_v39, %v1628_v8 }
 0x194   : > { %v343_v40 = vpop.xlane.xlu1 %342 }
 0x195   : > { %v351_v41 = vrot.slane %v343_v40, %v1628_v8 }
 0x198   : > { %v345_v42 = vpop.xlane.xlu1 %344 }
 0x199   : > { %v355_v44 = vrot.slane %v345_v42, %v1628_v8 }
 0x19b   : > { %v356_v45 = vsel %vm332_vm1, %v355_v44, %v351_v41 }
 0x19c   : > { %v358_v46 = vadd.f32 %v356_v45, %v338_v43 }
 0x19e   : > { %359 = vst.msk [vmem:[#allocation5] sm:$0x3] %vm336_vm2, %v358_v46 }
 0x1e1   : > { %v321_v48 = vpop.xlane.xlu0 %320 }
 0x1e2   : > { %v331_v51 = vrot.slane %v321_v48, %v1628_v8 }
 0x1e4   : > { %v333_v52 = vsel %vm332_vm1, %v331_v51, %v327_v49 }
 0x1e5   : > { %v335_v53 = vadd.f32 %v333_v52, %v299_v50 }
 0x1e7   : > { %337 = vst.msk [vmem:[#allocation4] sm:$0x3] %vm336_vm2, %v335_v53 }
 0x1e9   : > { %v404_v54 = vpop.xlane.xlu1 %403 }
 0x1ea   : > { %v412_v58 = vrot.slane %v404_v54, %v1628_v8 }
 0x1ed   : > { %v406_v57 = vpop.xlane.xlu1 %405 }
 0x1ee   : > { %v416_v59 = vrot.slane %v406_v57, %v1628_v8 }
 0x1ef   : > { %425 = sbr.rel (%p1092_p3) target bundleno = 758 (0x2f6), region = 44 }
 0x1f0   : > { %v417_v61 = vsel %vm332_vm1, %v416_v59, %v412_v58 }
 0x1f1   : > { %v419_v62 = vadd.f32 %v417_v61, %v382_v60 }
 0x1f3   : > { %420 = vst.msk [vmem:[#allocation3] sm:$0x3] %vm336_vm2, %v419_v62 }
 0x1f4   : > { %vm446_vm6 = vcmp.le.s32.totalorder %v1624_v7, %v1622_v6  ;;  %v1487_v63 = vmov 0.0   ;;  %v1488_v3 = vmov 1.0   ;;  %vm1489_vm7 = vmmov 0   ;;  %v426_v11 = vld [vmem:[#allocation2] sm:$0x3] }
 0x1f5   : > { %1122 = vmatprep.subr.mxu0 %v1487_v63  ;;  %1127 = vmatprep.subr.mxu1 %v1487_v63  ;;  %v1094_v0 = vsel %vm446_vm6, 1.0, %v1487_v63  ;;  %vm435_vm8 = vcmp.ne.s32.totalorder %v1619_v2, 0  ;;  %v431_v13 = vld [vmem:[#allocation4] sm:$0x3]  ;;  %vm449_vm9 = vcmask 64512   ;;  %vm909_vm10 = vcmp.ne.s32.totalorder %v1619_v2, 2 }
 0x1f6   : > { %1123 = vmatpush3.msk.msra.mxu0 %vm446_vm6, %v1488_v3  ;;  %1124 = vmatprep.mubr.msk.f32.mxu0 %vm1489_vm7, %v1487_v63  ;;  %v561_v4 = vsub.f32 %v1094_v0, %v1094_v0  ;;  %v1093_v15 = vsel %vm435_vm8, 1.0, %v1487_v63  ;;  %v433_v35 = vld [vmem:[#allocation5] sm:$0x3]  ;;  %v1099_v50 = vsel %vm909_vm10, 1.0, %v1487_v63 }
 0x1f7   : > { %1129 = vmatprep.mubr.msk.f32.mxu1 %vm1489_vm7, %v1487_v63  ;;  %1132 = vmatprep.subr.mxu0 %v1487_v63 }
 0x1f8   : > { %v562_v5 = vand.u32 4294901760, %v561_v4 }
 0x1fa   : > { %v427_v1 = vld [vmem:[#allocation3] sm:$0x3]  ;;  %v563_v8 = vsub.f32 %v561_v4, %v562_v5 }
 0x1fb   : > { %1260 = vlog2.f32 %v427_v1 }
 0x1fc   : > { %v564_v9 = vand.u32 4294901760, %v563_v8 }
 0x1fe   : > { %1128 = vmatpush3.msra.mxu1 %v564_v9 }
 0x1ff   : > { %1137 = vmatprep.subr.mxu1 %v1487_v63 }
 0x208   : > { %v1261_v10 = vpop.eup %1260 }
 0x209   : > { %v429_v12 = vmul.f32 0.6931472, %v1261_v10 }
 0x20b   : > { %v430_v14 = vadd.f32 %v429_v12, %v426_v11 }
 0x20d   : > { %v432_v16 = vsub.f32 %v431_v13, %v430_v14  ;;  %v434_v40 = vsub.f32 %v433_v35, %v430_v14 }
 0x20f   : > { %v440_v17 = vmul.f32 %v1093_v15, %v432_v16  ;;  %v438_v6 = vsub.f32 0.0, %v432_v16  ;;  %v901_v46 = vmul.f32 %v1093_v15, %v434_v40 }
 0x211   : > { %v451_v18 = vsel %vm449_vm9, %v440_v17, 0  ;;  %v441_v19 = vsel %vm336_vm2, %v440_v17, 0.0  ;;  %v439_v7 = vmul.f32 %v1093_v15, %v438_v6 }
 0x212   : > { %v519_v20 = vand.u32 4294901760, %v451_v18  ;;  %442 = vadd.xlane.f32.xlu0 %v441_v19 }
 0x213   : > { %917 = vst.msk [vmem:[#allocation12] sm:$0x3] %vm336_vm2, %v439_v7  ;;  %v913_v55 = vmul.f32 0.5, %v439_v7 }
 0x214   : > { %v520_v21 = vsub.f32 %v451_v18, %v519_v20  ;;  %1130 = vmatmul.mubr.f32.vlgmr.msra.gmra.mxu1 %v519_v20 }
 0x215   : > { %1138 = vmatpush3.msk.msra.mxu1 %vm446_vm6, %v1488_v3  ;;  %1139 = vmatprep.mubr.msk.f32.mxu1 %vm1489_vm7, %v1487_v63 }
 0x216   : > { %v521_v22 = vand.u32 4294901760, %v520_v21  ;;  %1147 = vmatprep.subr.mxu1 %v1487_v63 }
 0x218   : > { %v522_v23 = vsub.f32 %v520_v21, %v521_v22  ;;  %1140 = vmatmul.mubr.f32.vlgmr.msra.gmra.mxu1 %v521_v22 }
 0x219   : > { %1148 = vmatpush3.msk.msra.mxu1 %vm446_vm6, %v1488_v3  ;;  %1149 = vmatprep.mubr.msk.f32.mxu1 %vm1489_vm7, %v1487_v63 }
 0x21a   : > { %v523_v24 = vand.u32 4294901760, %v522_v23 }
 0x21c   : > { %1125 = vmatmul.mubr.f32.vlgmr.msra.gmra.mxu0 %v523_v24  ;;  %1150 = vmatmul.mubr.f32.vlgmr.msra.gmra.mxu1 %v519_v20 }
 0x21d   : > { %1133 = vmatpush3.msra.mxu0 %v561_v4  ;;  %1134 = vmatprep.mubr.msk.f32.mxu0 %vm1489_vm7, %v1487_v63 }
 0x21e   : > { %1142 = vmatprep.subr.mxu0 %v1487_v63 }
 0x220   : > { %1135 = vmatmul.mubr.f32.vlgmr.msra.gmra.mxu0 %v520_v21 }
 0x221   : > { %1143 = vmatpush3.msra.mxu0 %v562_v5  ;;  %1144 = vmatprep.mubr.msk.f32.mxu0 %vm1489_vm7, %v1487_v63 }
 0x224   : > { %1145 = vmatmul.mubr.f32.vlgmr.msra.gmra.mxu0 %v519_v20 }
 0x29b   : > { %v443_v38 = vpop.xlane.xlu0 %442 }
 0x29c   : > { %v899_v43 = vadd.f32 %v443_v38, %v440_v17 }
 0x2d4   : > { %v601_v25 = vpop.f32.mrf.mxu1 }
 0x2d6   : > { %v1131_v26 = vpop.f32.mrf.mxu1 }
 0x2d8   : > { %v749_v27 = vpop.f32.mrf.mxu1 }
 0x2da   : > { %v1141_v28 = vpop.f32.mrf.mxu1 }
 0x2dc   : > { %v525_v29 = vpop.f32.mrf.mxu0  ;;  %v895_v30 = vpop.f32.mrf.mxu1 }
 0x2dd   : > { %v602_v33 = vadd.f32 %v601_v25, %v525_v29 }
 0x2de   : > { %v1126_v31 = vpop.f32.mrf.mxu0  ;;  %v1151_v32 = vpop.f32.mrf.mxu1 }
 0x2e0   : > { %v675_v34 = vpop.f32.mrf.mxu0 }
 0x2e1   : > { %v676_v36 = vadd.f32 %v675_v34, %v602_v33 }
 0x2e2   : > { %v1136_v37 = vpop.f32.mrf.mxu0 }
 0x2e3   : > { %v750_v39 = vadd.f32 %v749_v27, %v676_v36 }
 0x2e4   : > { %v823_v41 = vpop.f32.mrf.mxu0 }
 0x2e5   : > { %v824_v42 = vadd.f32 %v823_v41, %v750_v39 }
 0x2e6   : > { %v1146_v44 = vpop.f32.mrf.mxu0 }
 0x2e7   : > { %v896_v45 = vadd.f32 %v895_v30, %v824_v42 }
 0x2e9   : > { %v900_v47 = vsub.f32 %v899_v43, %v896_v45 }
 0x2eb   : > { %v902_v48 = vsub.f32 %v901_v46, %v900_v47  ;;  %vm905_vm11 = vcmp.gt.f32.partialorder %v901_v46, %v900_v47 }
 0x2ec   : > { %v1098_v49 = vsel %vm905_vm11, 1.0, %v1487_v63 }
 0x2ed   : > { %v903_v51 = vadd.f32 0.0001, %v902_v48  ;;  %v908_v52 = vmul.f32 %v1098_v49, %v1093_v15 }
 0x2ef   : > { %v904_v53 = vmax.f32 %v903_v51, 0.0  ;;  %v912_v54 = vmul.f32 %v1099_v50, %v908_v52 }
 0x2f1   : > { %v914_v56 = vmul.f32 0.5, %v904_v53  ;;  %918 = vst.msk [vmem:[#allocation14] sm:$0x3] %vm336_vm2, %v904_v53  ;;  %919 = vst.msk [vmem:[#allocation15] sm:$0x3] %vm336_vm2, %v912_v54 }
 0x2f3   : > { %v915_v57 = vadd.f32 %v914_v56, %v913_v55 }
 0x2f5   : > { %916 = vst.msk [vmem:[#allocation11] sm:$0x3] %vm336_vm2, %v915_v57 }
 0x2f6 PF: > { %p1699_p4 = scmp.eq.s32.totalorder %s1081_s24, 1  ;;  %s1490_s26 = smov [#allocation12]  }
 0x2f7   : > { %s942_s27 = sshll.u32 %s1490_s26, 4  ;;  %s943_s27 = int_to_ptr.vmem [resolvable:$true] %s942_s27 }
 0x2f8   : > { %s1316_s7 = scalar_lea.vmem %s943_s27, 32  ;;  %p1323_p10 = scmp.lt.s32.totalorder %s943_s27, %s943_s27 }
 0x2f9   : > { %p1317_p6 = scmp.ne.s32.totalorder %s943_s27, %s1316_s7  ;;  %p1324_p11 = scmp.lt.s32.totalorder %s1316_s7, %s1316_s7 }
 0x2fb   : > { %p1318_p8 = pnand %p1317_p6, %p1699_p4  ;;  %p1325_p13 = por %p1324_p11, %p1323_p10 }
 0x2fd   : > { %p1319_p9 = pneg %p1318_p8 }
 0x2ff   : > { %p1326_p0 = pnand %p1325_p13, %p1319_p9 }
 0x301   : > { %1329 = shalt.err (!%p1326_p0)
}
 0x302   : > { %1161 = dma.vmem_to_hbm [thread:$0]  (%p1699_p4), %s943_s27, 32, %s1764_s3, [#allocation13]  }
 0x303   : > { %s1491_s18 = smov [#allocation11]   ;;  %s1492_s9 = smov [#allocation14]  }
 0x304   : > { %s929_s30 = sshll.u32 %s1491_s18, 4  ;;  %s955_s12 = sshll.u32 %s1492_s9, 4  ;;  %s930_s30 = int_to_ptr.vmem [resolvable:$true] %s929_s30  ;;  %s956_s12 = int_to_ptr.vmem [resolvable:$true] %s955_s12 }
 0x305   : > { %s1340_s14 = scalar_lea.vmem %s930_s30, 32  ;;  %p1347_p7 = scmp.lt.s32.totalorder %s930_s30, %s930_s30 }
 0x306   : > { %p1341_p1 = scmp.ne.s32.totalorder %s930_s30, %s1340_s14  ;;  %p1348_p12 = scmp.lt.s32.totalorder %s1340_s14, %s1340_s14 }
 0x308   : > { %p1342_p2 = pnand %p1341_p1, %p1699_p4  ;;  %p1349_p3 = por %p1348_p12, %p1347_p7 }
 0x30a   : > { %p1343_p5 = pneg %p1342_p2 }
 0x30c   : > { %p1350_p6 = pnand %p1349_p3, %p1343_p5 }
 0x30e   : > { %1353 = shalt.err (!%p1350_p6)
}
 0x30f   : > { %1159 = dma.vmem_to_hbm [thread:$0]  (%p1699_p4), %s930_s30, 32, %s1763_s2, [#allocation8]  }
 0x310   : > { %s1364_s16 = scalar_lea.vmem %s956_s12, 32  ;;  %p1371_p11 = scmp.lt.s32.totalorder %s956_s12, %s956_s12 }
 0x311   : > { %p1365_p8 = scmp.ne.s32.totalorder %s956_s12, %s1364_s16  ;;  %p1372_p13 = scmp.lt.s32.totalorder %s1364_s16, %s1364_s16 }
 0x313   : > { %p1366_p9 = pnand %p1365_p8, %p1699_p4  ;;  %p1373_p0 = por %p1372_p13, %p1371_p11 }
 0x315   : > { %p1367_p10 = pneg %p1366_p9 }
 0x317   : > { %p1374_p1 = pnand %p1373_p0, %p1367_p10 }
 0x319   : > { %1377 = shalt.err (!%p1374_p1)
}
 0x31a   : > { %1163 = dma.vmem_to_hbm [thread:$0]  (%p1699_p4), %s956_s12, 32, %s1765_s4, [#allocation13]  }
 0x31b   : > { %s1493_s29 = smov [#allocation15]  }
 0x31c   : > { %s968_s10 = sshll.u32 %s1493_s29, 4  ;;  %s969_s10 = int_to_ptr.vmem [resolvable:$true] %s968_s10 }
 0x31d   : > { %s1388_s28 = scalar_lea.vmem %s969_s10, 32  ;;  %p1395_p12 = scmp.lt.s32.totalorder %s969_s10, %s969_s10 }
 0x31e   : > { %p1389_p2 = scmp.ne.s32.totalorder %s969_s10, %s1388_s28  ;;  %p1396_p3 = scmp.lt.s32.totalorder %s1388_s28, %s1388_s28 }
 0x320   : > { %p1390_p5 = pnand %p1389_p2, %p1699_p4  ;;  %p1397_p6 = por %p1396_p3, %p1395_p12 }
 0x322   : > { %p1391_p7 = pneg %p1390_p5 }
 0x324   : > { %p1398_p8 = pnand %p1397_p6, %p1391_p7 }
 0x326   : > { %1401 = shalt.err (!%p1398_p8)
}
 0x327   : > { %1165 = dma.vmem_to_hbm [thread:$0]  (%p1699_p4), %s969_s10, 32, %s1766_s5, [#allocation16]  }
 0x328   : > { %1445 = dma.done.wait (%p1699_p4), [#allocation8], 32  }
 0x329   : > { %1447 = vsyncadd (%p1699_p4), [#allocation8], 4294967264 }
 0x32a   : > { %1449 = dma.done.wait (%p1699_p4), [#allocation13], 64  }
 0x32b   : > { %1451 = vsyncadd (%p1699_p4), [#allocation13], 4294967232 }
 0x32c   : > { %1453 = dma.done.wait (%p1699_p4), [#allocation16], 32  }
 0x32d   : > { %1455 = vsyncadd (%p1699_p4), [#allocation16], 4294967264 }
 0x32e PF: > { %s23_s23 = sadd.s32 1, %s1478_s23   ;;  %s1776_s18 = smov %s1462_s19 }
 0x32f   : > { %p20_p9 = scmp.ge.s32.totalorder %s23_s23, 4   ;;  %s1777_s19 = smov %s1466_s20 }
 0x330   : > { %s1778_s20 = smov %s1601_s8  ;;  %s1779_s21 = smov %s1474_s22 }
 0x331   : > { %s1780_s22 = smov %s1782_s11  ;;  %22 = sbr.rel (!%p20_p9) target bundleno = 8 (0x8), region = 106 }
 0x336   :  { %993 = vsyncpa [#allocation7], 1 }
 0x337   :  { %995 = vsyncpa [#allocation7 + $0x1], 1 }
 0x338   :  { %996 = vsyncpa [#allocation10], 1 }
 0x339   :  { %997 = vsyncpa [#allocation8], 1 }
 0x33a   :  { %999 = vsyncpa [#allocation8 + $0x1], 1 }
 0x33b   :  { %1000 = vsyncpa [#allocation13], 1 }
 0x33c   :  { %1001 = vsyncpa [#allocation16], 1 }

</bundles_post_ra>
